<compile_context>
chip_gen: v7x
topology: tpu7x:2x2x1
jax: 0.10.0
libtpu: 0.0.40
codegen_flags: <defaults>
</compile_context>

<pallas_src>
import functools

import jax
import jax.numpy as jnp
from jax.experimental import pallas as pl
from jax.experimental.pallas import tpu as pltpu

STATE_SIZE = 412
STATE_PAD = 512          # 412 padded up to a multiple of 128 lanes
SIZE_1 = 32
SIZE_2 = 64
SIZE_3 = 32
OUT_PAD = 128            # fused actor+critic output slab width (lane-dense)


def _round_up(n, m):
    return ((n + m - 1) // m) * m


def policy_kernel(x_ref, w1_ref, w2_ref, w3_ref, wh_ref, b_ref, out_ref, *,
                  action_size):
    # Bias slab layout (8, 128) f32:
    #   row 0: b1 | 0,  row 1: b2 | 0,  row 2: b3 | 0,
    #   row 3: fused head bias (bf | bc | 0)
    b1 = b_ref[0:1, 0:SIZE_1]
    b2 = b_ref[1:2, 0:SIZE_2]
    b3 = b_ref[2:3, 0:SIZE_3]
    bh = b_ref[3:4, :]

    x = x_ref[...]                                       # (TILE_B, 512) bf16

    h = jnp.dot(x, w1_ref[...], preferred_element_type=jnp.float32) + b1
    h = jnp.maximum(h, 0.0).astype(jnp.bfloat16)
    h = jnp.dot(h, w2_ref[...], preferred_element_type=jnp.float32) + b2
    h = jnp.maximum(h, 0.0).astype(jnp.bfloat16)
    h = jnp.dot(h, w3_ref[...], preferred_element_type=jnp.float32) + b3
    h = jnp.maximum(h, 0.0).astype(jnp.bfloat16)

    # Fused actor+critic head: cols [0:A) actor logits, col A critic, rest pad.
    head = jnp.dot(h, wh_ref[...], preferred_element_type=jnp.float32) + bh

    lane = jax.lax.broadcasted_iota(jnp.int32, head.shape, 1)
    is_action = lane < action_size
    is_value = lane == action_size

    # Masked, numerically stable softmax over the action lanes only.
    logits = jnp.where(is_action, head, -1e30)
    m = jnp.max(logits, axis=-1, keepdims=True)
    e = jnp.exp(logits - m)                   # masked lanes underflow to 0
    probs = e / jnp.sum(e, axis=-1, keepdims=True)

    value = jnp.maximum(head, 0.0)            # critic ReLU (matches reference)

    out_ref[...] = jnp.where(is_action, probs,
                             jnp.where(is_value, value, 0.0))


def init_params(key, action_size):
    """Deterministic init mimicking PyTorch nn.Linear default (U[-1/sqrt(fan_in), +])."""
    def linear(key, fan_in, fan_out):
        kw, kb = jax.random.split(key)
        bound = 1.0 / jnp.sqrt(jnp.float32(fan_in))
        w = jax.random.uniform(kw, (fan_in, fan_out), jnp.float32, -bound, bound)
        b = jax.random.uniform(kb, (1, fan_out), jnp.float32, -bound, bound)
        return w, b

    k1, k2, k3, kf, kc = jax.random.split(key, 5)
    w1, b1 = linear(k1, STATE_SIZE, SIZE_1)
    w2, b2 = linear(k2, SIZE_1, SIZE_2)
    w3, b3 = linear(k3, SIZE_2, SIZE_3)
    wf, bf = linear(kf, SIZE_3, action_size)
    wc, bc = linear(kc, SIZE_3, 1)
    return dict(w1=w1, b1=b1, w2=w2, b2=b2, w3=w3, b3=b3,
                wf=wf, bf=bf, wc=wc, bc=bc)


def prepare_fused_params(params):
    """Pad/fuse/cast raw nn.Linear-style params for the kernel (do once)."""
    action_size = params["wf"].shape[1]
    assert action_size + 1 <= OUT_PAD

    w1 = jnp.pad(params["w1"], ((0, STATE_PAD - STATE_SIZE), (0, 0)))

    wh = jnp.zeros((SIZE_3, OUT_PAD), jnp.float32)
    wh = wh.at[:, :action_size].set(params["wf"])
    wh = wh.at[:, action_size].set(params["wc"][:, 0])

    b = jnp.zeros((8, OUT_PAD), jnp.float32)
    b = b.at[0, :SIZE_1].set(params["b1"][0])
    b = b.at[1, :SIZE_2].set(params["b2"][0])
    b = b.at[2, :SIZE_3].set(params["b3"][0])
    b = b.at[3, :action_size].set(params["bf"][0])
    b = b.at[3, action_size].set(params["bc"][0, 0])

    return dict(
        w1=w1.astype(jnp.bfloat16),
        w2=params["w2"].astype(jnp.bfloat16),
        w3=params["w3"].astype(jnp.bfloat16),
        wh=wh.astype(jnp.bfloat16),
        b=b,
        action_size=action_size,
    )


def policy_forward(x, fused):
    """x: (..., STATE_SIZE) -> (value (B,1) f32, action_probs (B,A) f32)."""
    action_size = fused["action_size"]
    x = x.reshape(-1, STATE_SIZE)
    B = x.shape[0]

    # Batch tiling: pipelined, double-buffered x tiles; weights stay resident.
    tile_b = min(512, _round_up(B, 8))
    b_pad = _round_up(B, tile_b)

    x_pad = jnp.zeros((b_pad, STATE_PAD), jnp.bfloat16)
    x_pad = x_pad.at[:B, :STATE_SIZE].set(x.astype(jnp.bfloat16))

    kernel = functools.partial(policy_kernel, action_size=action_size)

    matmul_elems = (STATE_PAD * SIZE_1 + SIZE_1 * SIZE_2
                    + SIZE_2 * SIZE_3 + SIZE_3 * OUT_PAD)
    cost = pl.CostEstimate(
        flops=2 * b_pad * matmul_elems,
        transcendentals=b_pad * OUT_PAD,
        bytes_accessed=(b_pad * STATE_PAD * 2          # x (bf16)
                        + matmul_elems * 2             # weights (bf16)
                        + 8 * OUT_PAD * 4              # bias slab
                        + b_pad * OUT_PAD * 4),        # output slab
    )

    out = pl.pallas_call(
        kernel,
        out_shape=jax.ShapeDtypeStruct((b_pad, OUT_PAD), jnp.float32),
        grid_spec=pltpu.PrefetchScalarGridSpec(
            num_scalar_prefetch=0,
            grid=(b_pad // tile_b,),
            in_specs=[
                pl.BlockSpec((tile_b, STATE_PAD), lambda i: (i, 0)),
                pl.BlockSpec((STATE_PAD, SIZE_1), lambda i: (0, 0)),
                pl.BlockSpec((SIZE_1, SIZE_2), lambda i: (0, 0)),
                pl.BlockSpec((SIZE_2, SIZE_3), lambda i: (0, 0)),
                pl.BlockSpec((SIZE_3, OUT_PAD), lambda i: (0, 0)),
                pl.BlockSpec((8, OUT_PAD), lambda i: (0, 0)),
            ],
            out_specs=pl.BlockSpec((tile_b, OUT_PAD), lambda i: (i, 0)),
        ),
        compiler_params=pltpu.CompilerParams(
            dimension_semantics=("parallel",),
        ),
        cost_estimate=cost,
    )(x_pad, fused["w1"], fused["w2"], fused["w3"], fused["wh"], fused["b"])

    probs = out[:B, :action_size]
    value = out[:B, action_size:action_size + 1]
    return value, probs


def reference_forward(x, params):
    """Pure-JAX f32 reference matching the PyTorch module."""
    x = x.reshape(-1, STATE_SIZE).astype(jnp.float32)
    h = jax.nn.relu(x @ params["w1"] + params["b1"])
    h = jax.nn.relu(h @ params["w2"] + params["b2"])
    h = jax.nn.relu(h @ params["w3"] + params["b3"])
    probs = jax.nn.softmax(h @ params["wf"] + params["bf"], axis=-1)
    value = jax.nn.relu(h @ params["wc"] + params["bc"])
    return value, probs


if __name__ == "__main__":
    key = jax.random.PRNGKey(0)
    k_params, k_x = jax.random.split(key)

    batch = 2
    action_size = 6

    params = init_params(k_params, action_size)
    fused = prepare_fused_params(params)
    x = jax.random.normal(k_x, (batch, STATE_SIZE), jnp.float32)

    value, probs = policy_forward(x, fused)
    jax.block_until_ready((value, probs))

    assert value.shape == (batch, 1)
    assert probs.shape == (batch, action_size)
    # softmax rows must sum to 1, value must be non-negative (relu)
    assert bool(jnp.allclose(jnp.sum(probs, axis=-1), 1.0, atol=1e-4))
    assert bool(jnp.all(value >= 0.0))

    # compare against f32 reference (bf16 inputs/weights -> loose tolerance)
    v_ref, p_ref = reference_forward(x, params)
    assert bool(jnp.allclose(probs, p_ref, atol=5e-2, rtol=5e-2))
    assert bool(jnp.allclose(value, v_ref, atol=5e-2, rtol=5e-2))

    print("KERNEL_OK")
</pallas_src>

<mosaic_0001>
module attributes {stable_mosaic.version = 11 : i64} {
  func.func @policy_kernel(%arg0: i32, %arg1: memref<8x512xbf16, #tpu.memory_space<vmem>>, %arg2: memref<512x32xbf16, #tpu.memory_space<vmem>>, %arg3: memref<32x64xbf16, #tpu.memory_space<vmem>>, %arg4: memref<64x32xbf16, #tpu.memory_space<vmem>>, %arg5: memref<32x128xbf16, #tpu.memory_space<vmem>>, %arg6: memref<8x128xf32, #tpu.memory_space<vmem>>, %arg7: memref<8x128xf32, #tpu.memory_space<vmem>>) attributes {dimension_semantics = [#tpu.dimension_semantics<parallel>], iteration_bounds = array<i64: 1>, scalar_prefetch = 0 : i64, scratch_operands = 0 : i64, tpu.core_type = #tpu.core_type<tc>, window_params = [{transform_indices = @transform_0, window_bounds = array<i64: 8, 512>}, {pipeline_mode = #tpu.pipeline_mode<synchronous>, transform_indices = @transform_1, window_bounds = array<i64: 512, 32>}, {pipeline_mode = #tpu.pipeline_mode<synchronous>, transform_indices = @transform_2, window_bounds = array<i64: 32, 64>}, {pipeline_mode = #tpu.pipeline_mode<synchronous>, transform_indices = @transform_3, window_bounds = array<i64: 64, 32>}, {pipeline_mode = #tpu.pipeline_mode<synchronous>, transform_indices = @transform_4, window_bounds = array<i64: 32, 128>}, {pipeline_mode = #tpu.pipeline_mode<synchronous>, transform_indices = @transform_5, window_bounds = array<i64: 8, 128>}, {transform_indices = @transform_6, window_bounds = array<i64: 8, 128>}]} {
    %c0 = arith.constant 0 : index
    %c0_0 = arith.constant 0 : index
    %0 = vector.load %arg6[%c0, %c0_0] : memref<8x128xf32, #tpu.memory_space<vmem>>, vector<1x32xf32>
    %c1 = arith.constant 1 : index
    %c0_1 = arith.constant 0 : index
    %1 = vector.load %arg6[%c1, %c0_1] : memref<8x128xf32, #tpu.memory_space<vmem>>, vector<1x64xf32>
    %c2 = arith.constant 2 : index
    %c0_2 = arith.constant 0 : index
    %2 = vector.load %arg6[%c2, %c0_2] : memref<8x128xf32, #tpu.memory_space<vmem>>, vector<1x32xf32>
    %c3 = arith.constant 3 : index
    %c0_3 = arith.constant 0 : index
    %3 = vector.load %arg6[%c3, %c0_3] : memref<8x128xf32, #tpu.memory_space<vmem>>, vector<1x128xf32>
    %c0_4 = arith.constant 0 : index
    %c0_5 = arith.constant 0 : index
    %4 = vector.load %arg1[%c0_4, %c0_5] : memref<8x512xbf16, #tpu.memory_space<vmem>>, vector<8x512xbf16>
    %c0_6 = arith.constant 0 : index
    %c0_7 = arith.constant 0 : index
    %5 = vector.load %arg2[%c0_6, %c0_7] : memref<512x32xbf16, #tpu.memory_space<vmem>>, vector<512x32xbf16>
    %cst = arith.constant dense<0.000000e+00> : vector<8x32xf32>
    %6 = tpu.matmul %4, %5, %cst {dimension_numbers = #tpu.dot_dimension_numbers<[1], [0], [0], [1], [0, 0, 1, 1], [], []>} : vector<8x512xbf16>, vector<512x32xbf16>, vector<8x32xf32> -> vector<8x32xf32>
    %7 = vector.broadcast %0 : vector<1x32xf32> to vector<8x32xf32>
    %8 = arith.addf %6, %7 : vector<8x32xf32>
    %cst_8 = arith.constant 0.000000e+00 : f32
    %9 = vector.broadcast %cst_8 : f32 to vector<8x32xf32>
    %10 = arith.maximumf %8, %9 : vector<8x32xf32>
    %11 = arith.truncf %10 : vector<8x32xf32> to vector<8x32xbf16>
    %c0_9 = arith.constant 0 : index
    %c0_10 = arith.constant 0 : index
    %12 = vector.load %arg3[%c0_9, %c0_10] : memref<32x64xbf16, #tpu.memory_space<vmem>>, vector<32x64xbf16>
    %cst_11 = arith.constant dense<0.000000e+00> : vector<8x64xf32>
    %13 = tpu.matmul %11, %12, %cst_11 {dimension_numbers = #tpu.dot_dimension_numbers<[1], [0], [0], [1], [0, 0, 1, 1], [], []>} : vector<8x32xbf16>, vector<32x64xbf16>, vector<8x64xf32> -> vector<8x64xf32>
    %14 = vector.broadcast %1 : vector<1x64xf32> to vector<8x64xf32>
    %15 = arith.addf %13, %14 : vector<8x64xf32>
    %cst_12 = arith.constant 0.000000e+00 : f32
    %16 = vector.broadcast %cst_12 : f32 to vector<8x64xf32>
    %17 = arith.maximumf %15, %16 : vector<8x64xf32>
    %18 = arith.truncf %17 : vector<8x64xf32> to vector<8x64xbf16>
    %c0_13 = arith.constant 0 : index
    %c0_14 = arith.constant 0 : index
    %19 = vector.load %arg4[%c0_13, %c0_14] : memref<64x32xbf16, #tpu.memory_space<vmem>>, vector<64x32xbf16>
    %cst_15 = arith.constant dense<0.000000e+00> : vector<8x32xf32>
    %20 = tpu.matmul %18, %19, %cst_15 {dimension_numbers = #tpu.dot_dimension_numbers<[1], [0], [0], [1], [0, 0, 1, 1], [], []>} : vector<8x64xbf16>, vector<64x32xbf16>, vector<8x32xf32> -> vector<8x32xf32>
    %21 = vector.broadcast %2 : vector<1x32xf32> to vector<8x32xf32>
    %22 = arith.addf %20, %21 : vector<8x32xf32>
    %cst_16 = arith.constant 0.000000e+00 : f32
    %23 = vector.broadcast %cst_16 : f32 to vector<8x32xf32>
    %24 = arith.maximumf %22, %23 : vector<8x32xf32>
    %25 = arith.truncf %24 : vector<8x32xf32> to vector<8x32xbf16>
    %c0_17 = arith.constant 0 : index
    %c0_18 = arith.constant 0 : index
    %26 = vector.load %arg5[%c0_17, %c0_18] : memref<32x128xbf16, #tpu.memory_space<vmem>>, vector<32x128xbf16>
    %cst_19 = arith.constant dense<0.000000e+00> : vector<8x128xf32>
    %27 = tpu.matmul %25, %26, %cst_19 {dimension_numbers = #tpu.dot_dimension_numbers<[1], [0], [0], [1], [0, 0, 1, 1], [], []>} : vector<8x32xbf16>, vector<32x128xbf16>, vector<8x128xf32> -> vector<8x128xf32>
    %28 = vector.broadcast %3 : vector<1x128xf32> to vector<8x128xf32>
    %29 = arith.addf %27, %28 : vector<8x128xf32>
    %30 = tpu.iota {dimensions = array<i32: 1>} : vector<8x128xi32>
    %c6_i32 = arith.constant 6 : i32
    %31 = vector.broadcast %c6_i32 : i32 to vector<8x128xi32>
    %32 = arith.cmpi slt, %30, %31 : vector<8x128xi32>
    %c6_i32_20 = arith.constant 6 : i32
    %33 = vector.broadcast %c6_i32_20 : i32 to vector<8x128xi32>
    %34 = arith.cmpi eq, %30, %33 : vector<8x128xi32>
    %cst_21 = arith.constant -1.000000e+30 : f32
    %35 = vector.broadcast %cst_21 : f32 to vector<8x128xf32>
    %36 = arith.select %32, %29, %35 : vector<8x128xi1>, vector<8x128xf32>
    %cst_22 = arith.constant dense<0xFF800000> : vector<8xf32>
    %37 = vector.multi_reduction <maximumf>, %36, %cst_22 [1] : vector<8x128xf32> to vector<8xf32>
    %38 = vector.shape_cast %37 : vector<8xf32> to vector<8x1xf32>
    %39 = vector.broadcast %38 : vector<8x1xf32> to vector<8x128xf32>
    %40 = arith.subf %36, %39 : vector<8x128xf32>
    %41 = math.exp %40 : vector<8x128xf32>
    %cst_23 = arith.constant dense<0.000000e+00> : vector<8xf32>
    %42 = vector.multi_reduction <add>, %41, %cst_23 [1] : vector<8x128xf32> to vector<8xf32>
    %43 = vector.shape_cast %42 : vector<8xf32> to vector<8x1xf32>
    %44 = vector.broadcast %43 : vector<8x1xf32> to vector<8x128xf32>
    %45 = arith.divf %41, %44 : vector<8x128xf32>
    %cst_24 = arith.constant 0.000000e+00 : f32
    %46 = vector.broadcast %cst_24 : f32 to vector<8x128xf32>
    %47 = arith.maximumf %29, %46 : vector<8x128xf32>
    %cst_25 = arith.constant 0.000000e+00 : f32
    %48 = vector.broadcast %cst_25 : f32 to vector<8x128xf32>
    %49 = arith.select %34, %47, %48 : vector<8x128xi1>, vector<8x128xf32>
    %50 = arith.select %32, %45, %49 : vector<8x128xi1>, vector<8x128xf32>
    %c0_26 = arith.constant 0 : index
    %c0_27 = arith.constant 0 : index
    %51 = vector.load %arg7[%c0_26, %c0_27] : memref<8x128xf32, #tpu.memory_space<vmem>>, vector<8x128xf32>
    tpu.vector_store %arg7[%c0_26, %c0_27], %50 {strides = array<i32>} : memref<8x128xf32, #tpu.memory_space<vmem>>, vector<8x128xf32>,
    return
  }
  func.func @transform_0(%arg0: i32) -> (i32, i32) {
    %c0_i32 = arith.constant 0 : i32
    %c0_i32_0 = arith.constant 0 : i32
    return %arg0, %c0_i32 : i32, i32
  }
  func.func @transform_1(%arg0: i32) -> (i32, i32) {
    %c0_i32 = arith.constant 0 : i32
    %c0_i32_0 = arith.constant 0 : i32
    %c0_i32_1 = arith.constant 0 : i32
    return %c0_i32, %c0_i32_0 : i32, i32
  }
  func.func @transform_2(%arg0: i32) -> (i32, i32) {
    %c0_i32 = arith.constant 0 : i32
    %c0_i32_0 = arith.constant 0 : i32
    %c0_i32_1 = arith.constant 0 : i32
    return %c0_i32, %c0_i32_0 : i32, i32
  }
  func.func @transform_3(%arg0: i32) -> (i32, i32) {
    %c0_i32 = arith.constant 0 : i32
    %c0_i32_0 = arith.constant 0 : i32
    %c0_i32_1 = arith.constant 0 : i32
    return %c0_i32, %c0_i32_0 : i32, i32
  }
  func.func @transform_4(%arg0: i32) -> (i32, i32) {
    %c0_i32 = arith.constant 0 : i32
    %c0_i32_0 = arith.constant 0 : i32
    %c0_i32_1 = arith.constant 0 : i32
    return %c0_i32, %c0_i32_0 : i32, i32
  }
  func.func @transform_5(%arg0: i32) -> (i32, i32) {
    %c0_i32 = arith.constant 0 : i32
    %c0_i32_0 = arith.constant 0 : i32
    %c0_i32_1 = arith.constant 0 : i32
    return %c0_i32, %c0_i32_0 : i32, i32
  }
  func.func @transform_6(%arg0: i32) -> (i32, i32) {
    %c0_i32 = arith.constant 0 : i32
    %c0_i32_0 = arith.constant 0 : i32
    return %arg0, %c0_i32 : i32, i32
  }
}

</mosaic_0001>

<bundles_post_ra>
// kernel: tpu_custom_call.1
= control target key start
LH: loop header
LB: loop body
LE: loop exit
PB: predicated region body
PF: predicated region fallthrough
CT: control target
= control target key end

     0   :  { %s1034_s0 = inlined_call_operand.vmem [shape: bf16[8,512], index: 0, kind: input, shape index: {}]   ;;  %s1035_s1 = inlined_call_operand.vmem [shape: bf16[512,32], index: 1, kind: input, shape index: {}]   ;;  %s1036_s2 = inlined_call_operand.vmem [shape: bf16[32,64], index: 2, kind: input, shape index: {}]   ;;  %s1037_s3 = inlined_call_operand.vmem [shape: bf16[64,32], index: 3, kind: input, shape index: {}]   ;;  %s1038_s4 = inlined_call_operand.vmem [shape: bf16[32,128], index: 4, kind: input, shape index: {}]   ;;  %s1039_s5 = inlined_call_operand.vmem [shape: f32[8,128], index: 5, kind: input, shape index: {}]   ;;  %s1040_s6 = inlined_call_operand.hbm [shape: f32[8,128], index: 6, kind: output, shape index: {}]  }
   0x1   :  { %v767_v0 = vld [vmem:[%s1035_s1 + $0x40] sm:$0xff]   ;;  %v771_v4 = vld [vmem:[%s1035_s1 + $0x48] sm:$0xff]   ;;  %v775_v8 = vld [vmem:[%s1035_s1 + $0x50] sm:$0xff]  }
   0x2   :  { %v768_v1 = vld [vmem:[%s1035_s1 + $0xc0] sm:$0xff]   ;;  %681 = vmatprep.subr.bf16.mxu0 %v767_v0  ;;  %v772_v5 = vld [vmem:[%s1035_s1 + $0xc8] sm:$0xff]   ;;  %v776_v9 = vld [vmem:[%s1035_s1 + $0xd0] sm:$0xff]  }
   0x3   :  { %v769_v2 = vld [vmem:[%s1035_s1] sm:$0xff]   ;;  %703 = vmatprep.subr.bf16.mxu1 %v768_v1  ;;  %v773_v6 = vld [vmem:[%s1035_s1 + $0x8] sm:$0xff]   ;;  %v777_v10 = vld [vmem:[%s1035_s1 + $0x10] sm:$0xff]  }
   0x4   :  { %v770_v3 = vld [vmem:[%s1035_s1 + $0x80] sm:$0xff]   ;;  %682 = vmatpush3.bf16.msra.mxu0 %v769_v2  ;;  %v774_v7 = vld [vmem:[%s1035_s1 + $0x88] sm:$0xff]   ;;  %v778_v11 = vld [vmem:[%s1035_s1 + $0x90] sm:$0xff]  }
   0x5   :  { %704 = vmatpush3.bf16.msra.mxu1 %v770_v3  ;;  %683 = vmatprep.subr.bf16.mxu0 %v771_v4  ;;  %v779_v12 = vld [vmem:[%s1035_s1 + $0x58] sm:$0xff]   ;;  %v783_v16 = vld [vmem:[%s1035_s1 + $0x60] sm:$0xff]   ;;  %v787_v20 = vld [vmem:[%s1035_s1 + $0x68] sm:$0xff]  }
   0x6   :  { %705 = vmatprep.subr.bf16.mxu1 %v772_v5  ;;  %v780_v13 = vld [vmem:[%s1035_s1 + $0xd8] sm:$0xff]   ;;  %v784_v17 = vld [vmem:[%s1035_s1 + $0xe0] sm:$0xff]   ;;  %v788_v21 = vld [vmem:[%s1035_s1 + $0xe8] sm:$0xff]  }
   0x7   :  { %v781_v14 = vld [vmem:[%s1035_s1 + $0x18] sm:$0xff]   ;;  %v785_v18 = vld [vmem:[%s1035_s1 + $0x20] sm:$0xff]   ;;  %v789_v22 = vld [vmem:[%s1035_s1 + $0x28] sm:$0xff]  }
   0x8   :  { %684 = vmatpush3.bf16.msra.mxu0 %v773_v6  ;;  %v782_v15 = vld [vmem:[%s1035_s1 + $0x98] sm:$0xff]   ;;  %v786_v19 = vld [vmem:[%s1035_s1 + $0xa0] sm:$0xff]   ;;  %v790_v23 = vld [vmem:[%s1035_s1 + $0xa8] sm:$0xff]  }
   0x9   :  { %706 = vmatpush3.bf16.msra.mxu1 %v774_v7  ;;  %685 = vmatprep.subr.bf16.mxu0 %v775_v8  ;;  %v791_v24 = vld [vmem:[%s1035_s1 + $0x70] sm:$0xff]   ;;  %v795_v28 = vld [vmem:[%s1035_s1 + $0x78] sm:$0xff]   ;;  %v29_v32 = vld [vmem:[%s1034_s0] sm:$0xff] }
   0xa   :  { %707 = vmatprep.subr.bf16.mxu1 %v776_v9  ;;  %v792_v25 = vld [vmem:[%s1035_s1 + $0xf0] sm:$0xff]   ;;  %v796_v29 = vld [vmem:[%s1035_s1 + $0xf8] sm:$0xff]   ;;  %v30_v33 = vld [vmem:[%s1034_s0 + $0x8] sm:$0xff]  ;;  %v631_v34 = vcombine.low %v29_v32, %v29_v32  ;;  %v632_v35 = vcombine.high %v29_v32, %v29_v32 }
   0xb   :  { %v793_v26 = vld [vmem:[%s1035_s1 + $0x30] sm:$0xff]   ;;  %v797_v30 = vld [vmem:[%s1035_s1 + $0x38] sm:$0xff]   ;;  %v633_v36 = vcombine.low %v30_v33, %v30_v33  ;;  %v634_v37 = vcombine.high %v30_v33, %v30_v33 }
   0xc   :  { %686 = vmatpush3.bf16.msra.mxu0 %v777_v10  ;;  %v794_v27 = vld [vmem:[%s1035_s1 + $0xb0] sm:$0xff]   ;;  %v798_v31 = vld [vmem:[%s1035_s1 + $0xb8] sm:$0xff]   ;;  %337 = vmatprep.mubr.bf16.mxu0 %v632_v35 }
   0xd   :  { %708 = vmatpush3.bf16.msra.mxu1 %v778_v11  ;;  %687 = vmatprep.subr.bf16.mxu0 %v779_v12 }
   0xe   :  { %709 = vmatprep.subr.bf16.mxu1 %v780_v13  ;;  %377 = vmatprep.mubr.bf16.mxu1 %v634_v37 }
  0x10   :  { %688 = vmatpush3.bf16.msra.mxu0 %v781_v14 }
  0x11   :  { %710 = vmatpush3.bf16.msra.mxu1 %v782_v15  ;;  %689 = vmatprep.subr.bf16.mxu0 %v783_v16 }
  0x12   :  { %711 = vmatprep.subr.bf16.mxu1 %v784_v17 }
  0x14   :  { %690 = vmatpush3.bf16.msra.mxu0 %v785_v18 }
  0x15   :  { %712 = vmatpush3.bf16.msra.mxu1 %v786_v19  ;;  %691 = vmatprep.subr.bf16.mxu0 %v787_v20 }
  0x16   :  { %713 = vmatprep.subr.bf16.mxu1 %v788_v21 }
  0x18   :  { %692 = vmatpush3.bf16.msra.mxu0 %v789_v22 }
  0x19   :  { %714 = vmatpush3.bf16.msra.mxu1 %v790_v23  ;;  %693 = vmatprep.subr.bf16.mxu0 %v791_v24 }
  0x1a   :  { %715 = vmatprep.subr.bf16.mxu1 %v792_v25 }
  0x1c   :  { %694 = vmatpush3.bf16.msra.mxu0 %v793_v26 }
  0x1d   :  { %716 = vmatpush3.bf16.msra.mxu1 %v794_v27  ;;  %695 = vmatprep.subr.bf16.mxu0 %v795_v28 }
  0x1e   :  { %717 = vmatprep.subr.bf16.mxu1 %v796_v29 }
  0x20   :  { %696 = vmatpush3.bf16.msra.mxu0 %v797_v30 }
  0x21   :  { %718 = vmatpush3.bf16.msra.mxu1 %v798_v31 }
  0x23   :  { %338 = vmatmul.mubr.bf16.vlgmr.msra.gmra.mrb[0].mxu0 %v631_v34 }
  0x24   :  { %378 = vmatmul.mubr.bf16.vlgmr.msra.gmra.mrb[0].mxu1 %v633_v36 }
  0x25   :  { %11 = vsyncpa [#allocation3], 0  ;;  %v803_v38 = vld [vmem:[%s1036_s2] sm:$0xff]   ;;  %v839_v39 = vmov 0.0   ;;  %v804_v40 = vld [vmem:[%s1036_s2 + $0x8] sm:$0xff]   ;;  %vm840_vm0 = vmmov 0   ;;  %v598_v14 = vlaneseq }
  0x26   :  { %736 = vmatprep.subr.bf16.mxu0 %v839_v39  ;;  %744 = vmatprep.subr.bf16.mxu1 %v839_v39  ;;  %v805_v41 = vld [vmem:[%s1037_s3] sm:$0xff]   ;;  %v806_v42 = vld [vmem:[%s1037_s3 + $0x8] sm:$0xff]   ;;  %vm407_vm1 = vcmask 261120   ;;  %v807_v58 = vld [vmem:[%s1037_s3 + $0x10] sm:$0xff]   ;;  %vm489_vm2 = vcmask 523264  }
  0x27   :  { %737 = vmatpush3.bf16.msra.mxu0 %v803_v38  ;;  %740 = vmatprep.mubr.msk.bf16.mxu0 %vm840_vm0, %v839_v39  ;;  %v630_v45 = vld [vmem:[%s1039_s5] ss:$0 sm:$0xff]  ;;  %v808_v59 = vld [vmem:[%s1037_s3 + $0x18] sm:$0xff]   ;;  %v667_v61 = vld [vmem:[%s1039_s5 + $0x1] ss:$0 sm:$0xff]  ;;  %v599_v15 = vand.u32 127, %v598_v14 }
  0x28   :  { %738 = vmatprep.subr.bf16.mxu0 %v839_v39  ;;  %752 = vmatprep.mubr.msk.bf16.mxu1 %vm840_vm0, %v839_v39  ;;  %v809_v60 = vld [vmem:[%s1038_s4] sm:$0xff]   ;;  %v810_v5 = vld [vmem:[%s1038_s4 + $0x8] sm:$0xff]   ;;  %s841_s4 = smov [#allocation2]  }
  0x29   :  { %745 = vmatpush3.bf16.msra.mxu1 %v805_v41  ;;  %v671_v6 = vld [vmem:[%s1039_s5 + $0x2] ss:$0 sm:$0xff]  ;;  %v677_v16 = vld [vmem:[%s1039_s5 + $0x3] ss:$0 sm:$0xff]  ;;  %vm600_vm3 = vcmp.lt.s32.totalorder %v599_v15, 6  ;;  %vm601_vm4 = vcmp.eq.s32.totalorder %v599_v15, 6 }
  0x2a   :  { %746 = vmatprep.subr.bf16.mxu1 %v839_v39  ;;  %s622_s5 = sshll.u32 %s841_s4, 4  ;;  %s623_s5 = int_to_ptr.vmem [resolvable:$true] %s622_s5 }
  0x2b   :  { %739 = vmatpush3.bf16.msra.mxu0 %v804_v40  ;;  %s815_s13 = scalar_lea.vmem %s623_s5, 128  ;;  %p820_p1 = scmp.lt.s32.totalorder %s623_s5, %s623_s5 }
  0x2c   :  { %756 = vmatprep.subr.bf16.mxu0 %v839_v39  ;;  %p816_p0 = scmp.ne.s32.totalorder %s623_s5, %s815_s13  ;;  %p821_p2 = scmp.lt.s32.totalorder %s815_s13, %s815_s13 }
  0x2d   :  { %747 = vmatpush3.bf16.msra.mxu1 %v806_v42 }
  0x2e   :  { %748 = vmatprep.subr.bf16.mxu1 %v839_v39  ;;  %p822_p3 = por %p821_p2, %p820_p1 }
  0x30   :  { %p823_p4 = pnand %p822_p3, %p816_p0 }
  0x31   :  { %749 = vmatpush3.bf16.msra.mxu1 %v807_v58 }
  0x32   :  { %750 = vmatprep.subr.bf16.mxu1 %v839_v39 }
  0x35   :  { %751 = vmatpush3.bf16.msra.mxu1 %v808_v59 }
  0xf6   :  { %v697_v43 = vpop.f32.mrb[0].mxu0 }
  0xf7   :  { %v719_v44 = vpop.f32.mrb[0].mxu1  ;;  %v698_v46 = vpop.f32.mrb[1].mxu0 }
  0xf8   :  { %v720_v47 = vpop.f32.mrb[1].mxu1  ;;  %v699_v48 = vadd.f32 %v698_v46, %v697_v43  ;;  %v700_v50 = vpop.f32.mrb[2].mxu0 }
  0xf9   :  { %v721_v49 = vadd.f32 %v720_v47, %v719_v44  ;;  %v722_v51 = vpop.f32.mrb[2].mxu1  ;;  %v701_v52 = vpop.f32.mrb[3].mxu0 }
  0xfa   :  { %v723_v53 = vpop.f32.mrb[3].mxu1  ;;  %v340_v54 = vadd.f32 %v699_v48, %v630_v45 }
  0xfc   :  { %v380_v55 = vadd.f32 %v721_v49, %v340_v54 }
  0xfe   :  { %v385_v56 = vmax.f32 %v380_v55, 0.0 }
 0x100   :  { %v386_v57 = vpack.c.bf16 %v385_v56, %v385_v56 }
 0x102   :  { %741 = vmatmul.mubr.msk.bf16.vlgmr.msra.gmra.mrb[4].mxu0 %vm407_vm1, %v386_v57 }
 0x103   :  { %760 = vmatprep.mubr.msk.bf16.mxu0 %vm840_vm0, %v839_v39  ;;  %757 = vmatpush3.bf16.msra.mxu0 %v809_v60 }
 0x104   :  { %758 = vmatprep.subr.bf16.mxu0 %v839_v39 }
 0x107   :  { %759 = vmatpush3.bf16.msra.mxu0 %v810_v5 }
 0x1d5   :  { %v445_v62 = vpop.f32.mrb[4].mxu0 }
 0x1d6   :  { %v446_v63 = vadd.f32 %v667_v61, %v445_v62  ;;  %v742_v0 = vpop.f32.mrb[5].mxu0 }
 0x1d7   :  { %v448_v1 = vpop.f32.mrb[6].mxu0 }
 0x1d8   :  { %v451_v2 = vmax.f32 %v446_v63, 0.0  ;;  %v743_v3 = vpop.f32.mrb[7].mxu0 }
 0x1da   :  { %v452_v4 = vpack.c.bf16 %v451_v2, %v451_v2 }
 0x1dc   :  { %753 = vmatmul.mubr.msk.bf16.vlgmr.msra.gmra.mrb[4].mxu1 %vm489_vm2, %v452_v4 }
 0x2af   :  { %v527_v7 = vpop.f32.mrb[4].mxu1 }
 0x2b0   :  { %v528_v8 = vadd.f32 %v671_v6, %v527_v7  ;;  %v754_v9 = vpop.f32.mrb[5].mxu1 }
 0x2b1   :  { %v530_v10 = vpop.f32.mrb[6].mxu1 }
 0x2b2   :  { %v533_v11 = vmax.f32 %v528_v8, 0.0  ;;  %v755_v12 = vpop.f32.mrb[7].mxu1 }
 0x2b4   :  { %v534_v13 = vpack.c.bf16 %v533_v11, %v533_v11 }
 0x2b6   :  { %761 = vmatmul.mubr.msk.bf16.vlgmr.msra.gmra.mrb[8].mxu0 %vm407_vm1, %v534_v13 }
 0x389   :  { %v592_v17 = vpop.f32.mrb[8].mxu0 }
 0x38a   :  { %v593_v18 = vadd.f32 %v677_v16, %v592_v17  ;;  %v762_v19 = vpop.f32.mrb[9].mxu0 }
 0x38b   :  { %v595_v20 = vpop.f32.mrb[10].mxu0 }
 0x38c   :  { %v612_v21 = vmax.f32 %v593_v18, 0.0  ;;  %v763_v22 = vpop.f32.mrb[11].mxu0  ;;  %v602_v23 = vsel %vm600_vm3, %v593_v18, -1e+30 }
 0x38d   :  { %603 = vmax.xlane.f32.xlu0 %v602_v23 }
 0x38e   :  { %v613_v24 = vsel %vm601_vm4, %v612_v21, 0.0 }
 0x41a   :  { %v604_v25 = vpop.xlane.xlu0 %603 }
 0x41b   :  { %v605_v26 = vsub.f32 %v602_v23, %v604_v25 }
 0x41d   :  { %v606_v27 = vmul.f32 1.442695, %v605_v26 }
 0x41f   :  { %811 = vpow2.f32 %v606_v27 }
 0x429   :  { %v812_v28 = vpop.eup %811 }
 0x42a   :  { %608 = vadd.xlane.f32.xlu0 %v812_v28 }
 0x4b7   :  { %v609_v29 = vpop.xlane.xlu0 %608 }
 0x4b8   :  { %813 = vrcp.f32 %v609_v29 }
 0x4c2   :  { %v814_v30 = vpop.eup %813 }
 0x4c3   :  { %v611_v31 = vmul.f32 %v814_v30, %v812_v28 }
 0x4c5   :  { %v614_v32 = vsel %vm600_vm3, %v611_v31, %v613_v24 }
 0x4c6   :  { %615 = vst [vmem:[#allocation2] sm:$0xff] %v614_v32 }
 0x4c7   :  { %826 = shalt.err (!%p823_p4)
}
 0x4c8   :  { %s827_s16 = scalar_lea.hbm %s1040_s6, 128 }
 0x4c9   :  { %p828_p5 = scmp.ne.s32.totalorder %s1040_s6, %s827_s16  ;;  %p831_p6 = scmp.lt.u32.totalorder %s827_s16, %s1040_s6 }
 0x4cb   :  { %p833_p7 = pnand %p831_p6, %p828_p5 }
 0x4cd   :  { %836 = shalt.err (!%p833_p7)
}
 0x4ce   :  { %625 = dma.vmem_to_hbm [thread:$0]  %s623_s5, 128, %s1040_s6, [#allocation3]  }
 0x4cf   :  { %837 = dma.done.wait [#allocation3], 128  }
 0x4d0   :  { %838 = vsyncadd [#allocation3], 4294967168 }
 0x4d1   :  { %629 = vsyncpa [#allocation3], 1 }

</bundles_post_ra>
